<compile_context>
chip_gen: v5e
topology: v5e:2x2
jax: 0.10.0
libtpu: 0.0.40
codegen_flags: <defaults>
</compile_context>

<pallas_src>
import jax
import jax.numpy as jnp
from jax.experimental import pallas as pl
from jax.experimental.pallas import tpu as pltpu


def _sigmoid(v):
    # exact sigmoid via tanh: hits the EUP, avoids a VPU divide; identical
    # formula used in the pure-JAX reference.
    return 0.5 * (jnp.tanh(0.5 * v) + 1.0)


def _controller_kernel(x_ref, w_ih_ref, w_hh_ref, b_cat_ref, b_hh_n_ref,
                       h0_ref, w1_ref, b1_ref, w2_ref, b2_ref, rand_ref,
                       act_ref, prob_ref, hid_ref):
    T = x_ref.shape[0]
    H = h0_ref.shape[1]

    # --- hoisted input projections: one matmul for all timesteps -----------
    # (T, in) @ (in, 3H) + pre-folded biases -> (T, 3H)
    gi_all = jnp.dot(x_ref[...], w_ih_ref[...],
                     preferred_element_type=jnp.float32) + b_cat_ref[...]

    w_hh = w_hh_ref[...]            # (H, 3H) resident in vregs
    b_hh_n = b_hh_n_ref[...]        # (1, H)

    # --- GRU recurrence: statically unrolled, h carried in vregs -----------
    h = h0_ref[...].astype(jnp.float32)          # (1, H)
    for t in range(T):
        gi = gi_all[t:t + 1, :]                                   # (1, 3H)
        gh = jnp.dot(h, w_hh, preferred_element_type=jnp.float32)  # (1, 3H)
        r = _sigmoid(gi[:, 0:H] + gh[:, 0:H])
        z = _sigmoid(gi[:, H:2 * H] + gh[:, H:2 * H])
        n = jnp.tanh(gi[:, 2 * H:3 * H] + r * (gh[:, 2 * H:3 * H] + b_hh_n))
        h = (1.0 - z) * n + z * h

    hid_ref[...] = h.astype(hid_ref.dtype)

    # --- policy head + threshold -------------------------------------------
    y = jnp.dot(h, w1_ref[...], preferred_element_type=jnp.float32) + b1_ref[...]
    y = jnp.maximum(y, 0.0)
    logits = jnp.dot(y, w2_ref[...], preferred_element_type=jnp.float32) + b2_ref[...]
    probs = _sigmoid(logits)
    prob_ref[...] = probs.astype(prob_ref.dtype)
    # Threshold.forward: (probs - rand > 0).float()
    act_ref[...] = (probs - rand_ref[...] > 0.0).astype(act_ref.dtype)


def controller_forward(x, params, rand_vec, hidden=None):
    """Controller.forward.

    x:        (seq_len, input_dim) input sequence (unbatched, like nn.GRU)
    params:   dict of concatenated / pre-transposed weights (see init)
    rand_vec: (1, n_actions) uniform [0,1) sample (equivalent of torch.rand)
    hidden:   optional (1, hidden_dim) initial hidden state (zeros if None)
    returns   (actions, probs, hidden, cell=None)
    """
    w_ih_cat, w_hh_cat = params["w_ih_cat"], params["w_hh_cat"]
    b_cat, b_hh_n = params["b_cat"], params["b_hh_n"]
    w1_t, b1 = params["w1_t"], params["b1"]
    w2_t, b2 = params["w2_t"], params["b2"]

    hidden_dim = w_hh_cat.shape[0]
    n_actions = w2_t.shape[1]

    x = x.astype(jnp.float32)
    rand_vec = rand_vec.astype(jnp.float32)
    if hidden is None:
        hidden = jnp.zeros((1, hidden_dim), jnp.float32)
    else:
        hidden = hidden.astype(jnp.float32)

    vmem = pl.BlockSpec(memory_space=pltpu.MemorySpace.VMEM)
    n_in = 11

    actions, probs, h_out = pl.pallas_call(
        _controller_kernel,
        out_shape=(
            jax.ShapeDtypeStruct((1, n_actions), jnp.float32),
            jax.ShapeDtypeStruct((1, n_actions), jnp.float32),
            jax.ShapeDtypeStruct((1, hidden_dim), jnp.float32),
        ),
        in_specs=[vmem] * n_in,
        out_specs=(vmem, vmem, vmem),
    )(x, w_ih_cat, w_hh_cat, b_cat, b_hh_n, hidden,
      w1_t, b1, w2_t, b2, rand_vec)

    return actions, probs, h_out, None


def init_controller_params(key, input_dim, hidden_dim, n_actions, n_policy_hidden):
    """Deterministic init matching PyTorch defaults (U(-1/sqrt(fan), 1/sqrt(fan))).

    GRU weights are concatenated per gate (r, z, n) along the output axis and
    pre-transposed to (in_features, 3*hidden) so the kernel does plain x @ W.
    r/z biases are pre-folded (b_ih + b_hh); b_hh_n stays separate because it
    sits inside r * (...) in the PyTorch GRU update.
    """
    ks = jax.random.split(key, 8)
    H = hidden_dim
    lim_h = 1.0 / jnp.sqrt(hidden_dim)
    lim_p1 = 1.0 / jnp.sqrt(hidden_dim)
    lim_p2 = 1.0 / jnp.sqrt(n_policy_hidden)

    w_ih_cat = jax.random.uniform(ks[0], (input_dim, 3 * H), jnp.float32, -lim_h, lim_h)
    w_hh_cat = jax.random.uniform(ks[1], (hidden_dim, 3 * H), jnp.float32, -lim_h, lim_h)
    b_ih = jax.random.uniform(ks[2], (1, 3 * H), jnp.float32, -lim_h, lim_h)
    b_hh = jax.random.uniform(ks[3], (1, 3 * H), jnp.float32, -lim_h, lim_h)

    # fold r/z biases; keep b_hh_n separate (it's inside r*(...)).
    b_cat = jnp.concatenate(
        [b_ih[:, 0:H] + b_hh[:, 0:H],
         b_ih[:, H:2 * H] + b_hh[:, H:2 * H],
         b_ih[:, 2 * H:3 * H]], axis=1)
    b_hh_n = b_hh[:, 2 * H:3 * H]

    return dict(
        w_ih_cat=w_ih_cat,
        w_hh_cat=w_hh_cat,
        b_cat=b_cat,
        b_hh_n=b_hh_n,
        w1_t=jax.random.uniform(ks[4], (hidden_dim, n_policy_hidden), jnp.float32, -lim_p1, lim_p1),
        b1=jax.random.uniform(ks[5], (1, n_policy_hidden), jnp.float32, -lim_p1, lim_p1),
        w2_t=jax.random.uniform(ks[6], (n_policy_hidden, n_actions), jnp.float32, -lim_p2, lim_p2),
        b2=jax.random.uniform(ks[7], (1, n_actions), jnp.float32, -lim_p2, lim_p2),
    )


def controller_ref(x, params, rand_vec, hidden=None):
    """Pure-JAX reference for the same forward pass (PyTorch GRU gate math)."""
    w_ih, w_hh = params["w_ih_cat"], params["w_hh_cat"]
    b_cat, b_hh_n = params["b_cat"], params["b_hh_n"]
    w1_t, b1 = params["w1_t"], params["b1"]
    w2_t, b2 = params["w2_t"], params["b2"]
    H = w_hh.shape[0]
    h = jnp.zeros((1, H), jnp.float32) if hidden is None else hidden.astype(jnp.float32)
    for t in range(x.shape[0]):
        gi = x[t:t + 1] @ w_ih + b_cat
        gh = h @ w_hh
        r = _sigmoid(gi[:, 0:H] + gh[:, 0:H])
        z = _sigmoid(gi[:, H:2 * H] + gh[:, H:2 * H])
        n = jnp.tanh(gi[:, 2 * H:3 * H] + r * (gh[:, 2 * H:3 * H] + b_hh_n))
        h = (1.0 - z) * n + z * h
    y = jnp.maximum(h @ w1_t + b1, 0.0)
    probs = _sigmoid(y @ w2_t + b2)
    actions = (probs - rand_vec > 0.0).astype(jnp.float32)
    return actions, probs, h, None


if __name__ == "__main__":
    key = jax.random.PRNGKey(0)
    seq_len = 8
    input_dim = 16
    hidden_dim = 32
    n_actions = 4
    n_policy_hidden = 64

    k_params, k_x, k_rand = jax.random.split(key, 3)
    params = init_controller_params(k_params, input_dim, hidden_dim,
                                    n_actions, n_policy_hidden)
    x = jax.random.normal(k_x, (seq_len, input_dim), jnp.float32)
    rand_vec = jax.random.uniform(k_rand, (1, n_actions), jnp.float32)

    actions, probs, hidden, cell = controller_forward(x, params, rand_vec)
    actions, probs, hidden = jax.block_until_ready((actions, probs, hidden))

    a_ref, p_ref, h_ref, _ = controller_ref(x, params, rand_vec)

    assert actions.shape == (1, n_actions)
    assert probs.shape == (1, n_actions)
    assert hidden.shape == (1, hidden_dim)
    assert cell is None
    assert jnp.allclose(hidden, h_ref, atol=1e-4, rtol=1e-4)
    assert jnp.allclose(probs, p_ref, atol=1e-4, rtol=1e-4)
    # Threshold consistency: actions reproduce thresholding of the kernel's probs
    assert jnp.array_equal(actions, (probs - rand_vec > 0.0).astype(jnp.float32))

    print("KERNEL_OK")
</pallas_src>

<mosaic_0001>
module attributes {stable_mosaic.version = 11 : i64} {
  func.func @_controller_kernel(%arg0: memref<8x16xf32, #tpu.memory_space<vmem>>, %arg1: memref<16x96xf32, #tpu.memory_space<vmem>>, %arg2: memref<32x96xf32, #tpu.memory_space<vmem>>, %arg3: memref<1x96xf32, #tpu.memory_space<vmem>>, %arg4: memref<1x32xf32, #tpu.memory_space<vmem>>, %arg5: memref<1x32xf32, #tpu.memory_space<vmem>>, %arg6: memref<32x64xf32, #tpu.memory_space<vmem>>, %arg7: memref<1x64xf32, #tpu.memory_space<vmem>>, %arg8: memref<64x4xf32, #tpu.memory_space<vmem>>, %arg9: memref<1x4xf32, #tpu.memory_space<vmem>>, %arg10: memref<1x4xf32, #tpu.memory_space<vmem>>, %arg11: memref<1x4xf32, #tpu.memory_space<vmem>>, %arg12: memref<1x4xf32, #tpu.memory_space<vmem>>, %arg13: memref<1x32xf32, #tpu.memory_space<vmem>>) attributes {dimension_semantics = [], scalar_prefetch = 0 : i64, scratch_operands = 0 : i64, tpu.core_type = #tpu.core_type<tc>} {
    %c0 = arith.constant 0 : index
    %c0_0 = arith.constant 0 : index
    %0 = vector.load %arg0[%c0, %c0_0] : memref<8x16xf32, #tpu.memory_space<vmem>>, vector<8x16xf32>
    %c0_1 = arith.constant 0 : index
    %c0_2 = arith.constant 0 : index
    %1 = vector.load %arg1[%c0_1, %c0_2] : memref<16x96xf32, #tpu.memory_space<vmem>>, vector<16x96xf32>
    %cst = arith.constant dense<0.000000e+00> : vector<8x96xf32>
    %2 = tpu.matmul %0, %1, %cst {dimension_numbers = #tpu.dot_dimension_numbers<[1], [0], [0], [1], [0, 0, 1, 1], [], []>} : vector<8x16xf32>, vector<16x96xf32>, vector<8x96xf32> -> vector<8x96xf32>
    %c0_3 = arith.constant 0 : index
    %c0_4 = arith.constant 0 : index
    %3 = vector.load %arg3[%c0_3, %c0_4] : memref<1x96xf32, #tpu.memory_space<vmem>>, vector<1x96xf32>
    %4 = vector.broadcast %3 : vector<1x96xf32> to vector<8x96xf32>
    %5 = arith.addf %2, %4 : vector<8x96xf32>
    %c0_5 = arith.constant 0 : index
    %c0_6 = arith.constant 0 : index
    %6 = vector.load %arg2[%c0_5, %c0_6] : memref<32x96xf32, #tpu.memory_space<vmem>>, vector<32x96xf32>
    %c0_7 = arith.constant 0 : index
    %c0_8 = arith.constant 0 : index
    %7 = vector.load %arg4[%c0_7, %c0_8] : memref<1x32xf32, #tpu.memory_space<vmem>>, vector<1x32xf32>
    %c0_9 = arith.constant 0 : index
    %c0_10 = arith.constant 0 : index
    %8 = vector.load %arg5[%c0_9, %c0_10] : memref<1x32xf32, #tpu.memory_space<vmem>>, vector<1x32xf32>
    %9 = vector.extract_strided_slice %5 {offsets = [0, 0], sizes = [1, 96], strides = [1, 1]} : vector<8x96xf32> to vector<1x96xf32>
    %cst_11 = arith.constant dense<0.000000e+00> : vector<1x96xf32>
    %10 = tpu.matmul %8, %6, %cst_11 {dimension_numbers = #tpu.dot_dimension_numbers<[1], [0], [0], [1], [0, 0, 1, 1], [], []>} : vector<1x32xf32>, vector<32x96xf32>, vector<1x96xf32> -> vector<1x96xf32>
    %11 = vector.extract_strided_slice %9 {offsets = [0, 0], sizes = [1, 32], strides = [1, 1]} : vector<1x96xf32> to vector<1x32xf32>
    %12 = vector.extract_strided_slice %10 {offsets = [0, 0], sizes = [1, 32], strides = [1, 1]} : vector<1x96xf32> to vector<1x32xf32>
    %13 = arith.addf %11, %12 : vector<1x32xf32>
    %cst_12 = arith.constant 5.000000e-01 : f32
    %14 = vector.broadcast %cst_12 : f32 to vector<1x32xf32>
    %15 = arith.mulf %14, %13 : vector<1x32xf32>
    %16 = math.tanh %15 : vector<1x32xf32>
    %cst_13 = arith.constant 1.000000e+00 : f32
    %17 = vector.broadcast %cst_13 : f32 to vector<1x32xf32>
    %18 = arith.addf %16, %17 : vector<1x32xf32>
    %cst_14 = arith.constant 5.000000e-01 : f32
    %19 = vector.broadcast %cst_14 : f32 to vector<1x32xf32>
    %20 = arith.mulf %19, %18 : vector<1x32xf32>
    %21 = vector.extract_strided_slice %9 {offsets = [0, 32], sizes = [1, 32], strides = [1, 1]} : vector<1x96xf32> to vector<1x32xf32>
    %22 = vector.extract_strided_slice %10 {offsets = [0, 32], sizes = [1, 32], strides = [1, 1]} : vector<1x96xf32> to vector<1x32xf32>
    %23 = arith.addf %21, %22 : vector<1x32xf32>
    %cst_15 = arith.constant 5.000000e-01 : f32
    %24 = vector.broadcast %cst_15 : f32 to vector<1x32xf32>
    %25 = arith.mulf %24, %23 : vector<1x32xf32>
    %26 = math.tanh %25 : vector<1x32xf32>
    %cst_16 = arith.constant 1.000000e+00 : f32
    %27 = vector.broadcast %cst_16 : f32 to vector<1x32xf32>
    %28 = arith.addf %26, %27 : vector<1x32xf32>
    %cst_17 = arith.constant 5.000000e-01 : f32
    %29 = vector.broadcast %cst_17 : f32 to vector<1x32xf32>
    %30 = arith.mulf %29, %28 : vector<1x32xf32>
    %31 = vector.extract_strided_slice %9 {offsets = [0, 64], sizes = [1, 32], strides = [1, 1]} : vector<1x96xf32> to vector<1x32xf32>
    %32 = vector.extract_strided_slice %10 {offsets = [0, 64], sizes = [1, 32], strides = [1, 1]} : vector<1x96xf32> to vector<1x32xf32>
    %33 = arith.addf %32, %7 : vector<1x32xf32>
    %34 = arith.mulf %20, %33 : vector<1x32xf32>
    %35 = arith.addf %31, %34 : vector<1x32xf32>
    %36 = math.tanh %35 : vector<1x32xf32>
    %cst_18 = arith.constant 1.000000e+00 : f32
    %37 = vector.broadcast %cst_18 : f32 to vector<1x32xf32>
    %38 = arith.subf %37, %30 : vector<1x32xf32>
    %39 = arith.mulf %38, %36 : vector<1x32xf32>
    %40 = arith.mulf %30, %8 : vector<1x32xf32>
    %41 = arith.addf %39, %40 : vector<1x32xf32>
    %42 = vector.extract_strided_slice %5 {offsets = [1, 0], sizes = [1, 96], strides = [1, 1]} : vector<8x96xf32> to vector<1x96xf32>
    %cst_19 = arith.constant dense<0.000000e+00> : vector<1x96xf32>
    %43 = tpu.matmul %41, %6, %cst_19 {dimension_numbers = #tpu.dot_dimension_numbers<[1], [0], [0], [1], [0, 0, 1, 1], [], []>} : vector<1x32xf32>, vector<32x96xf32>, vector<1x96xf32> -> vector<1x96xf32>
    %44 = vector.extract_strided_slice %42 {offsets = [0, 0], sizes = [1, 32], strides = [1, 1]} : vector<1x96xf32> to vector<1x32xf32>
    %45 = vector.extract_strided_slice %43 {offsets = [0, 0], sizes = [1, 32], strides = [1, 1]} : vector<1x96xf32> to vector<1x32xf32>
    %46 = arith.addf %44, %45 : vector<1x32xf32>
    %cst_20 = arith.constant 5.000000e-01 : f32
    %47 = vector.broadcast %cst_20 : f32 to vector<1x32xf32>
    %48 = arith.mulf %47, %46 : vector<1x32xf32>
    %49 = math.tanh %48 : vector<1x32xf32>
    %cst_21 = arith.constant 1.000000e+00 : f32
    %50 = vector.broadcast %cst_21 : f32 to vector<1x32xf32>
    %51 = arith.addf %49, %50 : vector<1x32xf32>
    %cst_22 = arith.constant 5.000000e-01 : f32
    %52 = vector.broadcast %cst_22 : f32 to vector<1x32xf32>
    %53 = arith.mulf %52, %51 : vector<1x32xf32>
    %54 = vector.extract_strided_slice %42 {offsets = [0, 32], sizes = [1, 32], strides = [1, 1]} : vector<1x96xf32> to vector<1x32xf32>
    %55 = vector.extract_strided_slice %43 {offsets = [0, 32], sizes = [1, 32], strides = [1, 1]} : vector<1x96xf32> to vector<1x32xf32>
    %56 = arith.addf %54, %55 : vector<1x32xf32>
    %cst_23 = arith.constant 5.000000e-01 : f32
    %57 = vector.broadcast %cst_23 : f32 to vector<1x32xf32>
    %58 = arith.mulf %57, %56 : vector<1x32xf32>
    %59 = math.tanh %58 : vector<1x32xf32>
    %cst_24 = arith.constant 1.000000e+00 : f32
    %60 = vector.broadcast %cst_24 : f32 to vector<1x32xf32>
    %61 = arith.addf %59, %60 : vector<1x32xf32>
    %cst_25 = arith.constant 5.000000e-01 : f32
    %62 = vector.broadcast %cst_25 : f32 to vector<1x32xf32>
    %63 = arith.mulf %62, %61 : vector<1x32xf32>
    %64 = vector.extract_strided_slice %42 {offsets = [0, 64], sizes = [1, 32], strides = [1, 1]} : vector<1x96xf32> to vector<1x32xf32>
    %65 = vector.extract_strided_slice %43 {offsets = [0, 64], sizes = [1, 32], strides = [1, 1]} : vector<1x96xf32> to vector<1x32xf32>
    %66 = arith.addf %65, %7 : vector<1x32xf32>
    %67 = arith.mulf %53, %66 : vector<1x32xf32>
    %68 = arith.addf %64, %67 : vector<1x32xf32>
    %69 = math.tanh %68 : vector<1x32xf32>
    %cst_26 = arith.constant 1.000000e+00 : f32
    %70 = vector.broadcast %cst_26 : f32 to vector<1x32xf32>
    %71 = arith.subf %70, %63 : vector<1x32xf32>
    %72 = arith.mulf %71, %69 : vector<1x32xf32>
    %73 = arith.mulf %63, %41 : vector<1x32xf32>
    %74 = arith.addf %72, %73 : vector<1x32xf32>
    %75 = vector.extract_strided_slice %5 {offsets = [2, 0], sizes = [1, 96], strides = [1, 1]} : vector<8x96xf32> to vector<1x96xf32>
    %cst_27 = arith.constant dense<0.000000e+00> : vector<1x96xf32>
    %76 = tpu.matmul %74, %6, %cst_27 {dimension_numbers = #tpu.dot_dimension_numbers<[1], [0], [0], [1], [0, 0, 1, 1], [], []>} : vector<1x32xf32>, vector<32x96xf32>, vector<1x96xf32> -> vector<1x96xf32>
    %77 = vector.extract_strided_slice %75 {offsets = [0, 0], sizes = [1, 32], strides = [1, 1]} : vector<1x96xf32> to vector<1x32xf32>
    %78 = vector.extract_strided_slice %76 {offsets = [0, 0], sizes = [1, 32], strides = [1, 1]} : vector<1x96xf32> to vector<1x32xf32>
    %79 = arith.addf %77, %78 : vector<1x32xf32>
    %cst_28 = arith.constant 5.000000e-01 : f32
    %80 = vector.broadcast %cst_28 : f32 to vector<1x32xf32>
    %81 = arith.mulf %80, %79 : vector<1x32xf32>
    %82 = math.tanh %81 : vector<1x32xf32>
    %cst_29 = arith.constant 1.000000e+00 : f32
    %83 = vector.broadcast %cst_29 : f32 to vector<1x32xf32>
    %84 = arith.addf %82, %83 : vector<1x32xf32>
    %cst_30 = arith.constant 5.000000e-01 : f32
    %85 = vector.broadcast %cst_30 : f32 to vector<1x32xf32>
    %86 = arith.mulf %85, %84 : vector<1x32xf32>
    %87 = vector.extract_strided_slice %75 {offsets = [0, 32], sizes = [1, 32], strides = [1, 1]} : vector<1x96xf32> to vector<1x32xf32>
    %88 = vector.extract_strided_slice %76 {offsets = [0, 32], sizes = [1, 32], strides = [1, 1]} : vector<1x96xf32> to vector<1x32xf32>
    %89 = arith.addf %87, %88 : vector<1x32xf32>
    %cst_31 = arith.constant 5.000000e-01 : f32
    %90 = vector.broadcast %cst_31 : f32 to vector<1x32xf32>
    %91 = arith.mulf %90, %89 : vector<1x32xf32>
    %92 = math.tanh %91 : vector<1x32xf32>
    %cst_32 = arith.constant 1.000000e+00 : f32
    %93 = vector.broadcast %cst_32 : f32 to vector<1x32xf32>
    %94 = arith.addf %92, %93 : vector<1x32xf32>
    %cst_33 = arith.constant 5.000000e-01 : f32
    %95 = vector.broadcast %cst_33 : f32 to vector<1x32xf32>
    %96 = arith.mulf %95, %94 : vector<1x32xf32>
    %97 = vector.extract_strided_slice %75 {offsets = [0, 64], sizes = [1, 32], strides = [1, 1]} : vector<1x96xf32> to vector<1x32xf32>
    %98 = vector.extract_strided_slice %76 {offsets = [0, 64], sizes = [1, 32], strides = [1, 1]} : vector<1x96xf32> to vector<1x32xf32>
    %99 = arith.addf %98, %7 : vector<1x32xf32>
    %100 = arith.mulf %86, %99 : vector<1x32xf32>
    %101 = arith.addf %97, %100 : vector<1x32xf32>
    %102 = math.tanh %101 : vector<1x32xf32>
    %cst_34 = arith.constant 1.000000e+00 : f32
    %103 = vector.broadcast %cst_34 : f32 to vector<1x32xf32>
    %104 = arith.subf %103, %96 : vector<1x32xf32>
    %105 = arith.mulf %104, %102 : vector<1x32xf32>
    %106 = arith.mulf %96, %74 : vector<1x32xf32>
    %107 = arith.addf %105, %106 : vector<1x32xf32>
    %108 = vector.extract_strided_slice %5 {offsets = [3, 0], sizes = [1, 96], strides = [1, 1]} : vector<8x96xf32> to vector<1x96xf32>
    %cst_35 = arith.constant dense<0.000000e+00> : vector<1x96xf32>
    %109 = tpu.matmul %107, %6, %cst_35 {dimension_numbers = #tpu.dot_dimension_numbers<[1], [0], [0], [1], [0, 0, 1, 1], [], []>} : vector<1x32xf32>, vector<32x96xf32>, vector<1x96xf32> -> vector<1x96xf32>
    %110 = vector.extract_strided_slice %108 {offsets = [0, 0], sizes = [1, 32], strides = [1, 1]} : vector<1x96xf32> to vector<1x32xf32>
    %111 = vector.extract_strided_slice %109 {offsets = [0, 0], sizes = [1, 32], strides = [1, 1]} : vector<1x96xf32> to vector<1x32xf32>
    %112 = arith.addf %110, %111 : vector<1x32xf32>
    %cst_36 = arith.constant 5.000000e-01 : f32
    %113 = vector.broadcast %cst_36 : f32 to vector<1x32xf32>
    %114 = arith.mulf %113, %112 : vector<1x32xf32>
    %115 = math.tanh %114 : vector<1x32xf32>
    %cst_37 = arith.constant 1.000000e+00 : f32
    %116 = vector.broadcast %cst_37 : f32 to vector<1x32xf32>
    %117 = arith.addf %115, %116 : vector<1x32xf32>
    %cst_38 = arith.constant 5.000000e-01 : f32
    %118 = vector.broadcast %cst_38 : f32 to vector<1x32xf32>
    %119 = arith.mulf %118, %117 : vector<1x32xf32>
    %120 = vector.extract_strided_slice %108 {offsets = [0, 32], sizes = [1, 32], strides = [1, 1]} : vector<1x96xf32> to vector<1x32xf32>
    %121 = vector.extract_strided_slice %109 {offsets = [0, 32], sizes = [1, 32], strides = [1, 1]} : vector<1x96xf32> to vector<1x32xf32>
    %122 = arith.addf %120, %121 : vector<1x32xf32>
    %cst_39 = arith.constant 5.000000e-01 : f32
    %123 = vector.broadcast %cst_39 : f32 to vector<1x32xf32>
    %124 = arith.mulf %123, %122 : vector<1x32xf32>
    %125 = math.tanh %124 : vector<1x32xf32>
    %cst_40 = arith.constant 1.000000e+00 : f32
    %126 = vector.broadcast %cst_40 : f32 to vector<1x32xf32>
    %127 = arith.addf %125, %126 : vector<1x32xf32>
    %cst_41 = arith.constant 5.000000e-01 : f32
    %128 = vector.broadcast %cst_41 : f32 to vector<1x32xf32>
    %129 = arith.mulf %128, %127 : vector<1x32xf32>
    %130 = vector.extract_strided_slice %108 {offsets = [0, 64], sizes = [1, 32], strides = [1, 1]} : vector<1x96xf32> to vector<1x32xf32>
    %131 = vector.extract_strided_slice %109 {offsets = [0, 64], sizes = [1, 32], strides = [1, 1]} : vector<1x96xf32> to vector<1x32xf32>
    %132 = arith.addf %131, %7 : vector<1x32xf32>
    %133 = arith.mulf %119, %132 : vector<1x32xf32>
    %134 = arith.addf %130, %133 : vector<1x32xf32>
    %135 = math.tanh %134 : vector<1x32xf32>
    %cst_42 = arith.constant 1.000000e+00 : f32
    %136 = vector.broadcast %cst_42 : f32 to vector<1x32xf32>
    %137 = arith.subf %136, %129 : vector<1x32xf32>
    %138 = arith.mulf %137, %135 : vector<1x32xf32>
    %139 = arith.mulf %129, %107 : vector<1x32xf32>
    %140 = arith.addf %138, %139 : vector<1x32xf32>
    %141 = vector.extract_strided_slice %5 {offsets = [4, 0], sizes = [1, 96], strides = [1, 1]} : vector<8x96xf32> to vector<1x96xf32>
    %cst_43 = arith.constant dense<0.000000e+00> : vector<1x96xf32>
    %142 = tpu.matmul %140, %6, %cst_43 {dimension_numbers = #tpu.dot_dimension_numbers<[1], [0], [0], [1], [0, 0, 1, 1], [], []>} : vector<1x32xf32>, vector<32x96xf32>, vector<1x96xf32> -> vector<1x96xf32>
    %143 = vector.extract_strided_slice %141 {offsets = [0, 0], sizes = [1, 32], strides = [1, 1]} : vector<1x96xf32> to vector<1x32xf32>
    %144 = vector.extract_strided_slice %142 {offsets = [0, 0], sizes = [1, 32], strides = [1, 1]} : vector<1x96xf32> to vector<1x32xf32>
    %145 = arith.addf %143, %144 : vector<1x32xf32>
    %cst_44 = arith.constant 5.000000e-01 : f32
    %146 = vector.broadcast %cst_44 : f32 to vector<1x32xf32>
    %147 = arith.mulf %146, %145 : vector<1x32xf32>
    %148 = math.tanh %147 : vector<1x32xf32>
    %cst_45 = arith.constant 1.000000e+00 : f32
    %149 = vector.broadcast %cst_45 : f32 to vector<1x32xf32>
    %150 = arith.addf %148, %149 : vector<1x32xf32>
    %cst_46 = arith.constant 5.000000e-01 : f32
    %151 = vector.broadcast %cst_46 : f32 to vector<1x32xf32>
    %152 = arith.mulf %151, %150 : vector<1x32xf32>
    %153 = vector.extract_strided_slice %141 {offsets = [0, 32], sizes = [1, 32], strides = [1, 1]} : vector<1x96xf32> to vector<1x32xf32>
    %154 = vector.extract_strided_slice %142 {offsets = [0, 32], sizes = [1, 32], strides = [1, 1]} : vector<1x96xf32> to vector<1x32xf32>
    %155 = arith.addf %153, %154 : vector<1x32xf32>
    %cst_47 = arith.constant 5.000000e-01 : f32
    %156 = vector.broadcast %cst_47 : f32 to vector<1x32xf32>
    %157 = arith.mulf %156, %155 : vector<1x32xf32>
    %158 = math.tanh %157 : vector<1x32xf32>
    %cst_48 = arith.constant 1.000000e+00 : f32
    %159 = vector.broadcast %cst_48 : f32 to vector<1x32xf32>
    %160 = arith.addf %158, %159 : vector<1x32xf32>
    %cst_49 = arith.constant 5.000000e-01 : f32
    %161 = vector.broadcast %cst_49 : f32 to vector<1x32xf32>
    %162 = arith.mulf %161, %160 : vector<1x32xf32>
    %163 = vector.extract_strided_slice %141 {offsets = [0, 64], sizes = [1, 32], strides = [1, 1]} : vector<1x96xf32> to vector<1x32xf32>
    %164 = vector.extract_strided_slice %142 {offsets = [0, 64], sizes = [1, 32], strides = [1, 1]} : vector<1x96xf32> to vector<1x32xf32>
    %165 = arith.addf %164, %7 : vector<1x32xf32>
    %166 = arith.mulf %152, %165 : vector<1x32xf32>
    %167 = arith.addf %163, %166 : vector<1x32xf32>
    %168 = math.tanh %167 : vector<1x32xf32>
    %cst_50 = arith.constant 1.000000e+00 : f32
    %169 = vector.broadcast %cst_50 : f32 to vector<1x32xf32>
    %170 = arith.subf %169, %162 : vector<1x32xf32>
    %171 = arith.mulf %170, %168 : vector<1x32xf32>
    %172 = arith.mulf %162, %140 : vector<1x32xf32>
    %173 = arith.addf %171, %172 : vector<1x32xf32>
    %174 = vector.extract_strided_slice %5 {offsets = [5, 0], sizes = [1, 96], strides = [1, 1]} : vector<8x96xf32> to vector<1x96xf32>
    %cst_51 = arith.constant dense<0.000000e+00> : vector<1x96xf32>
    %175 = tpu.matmul %173, %6, %cst_51 {dimension_numbers = #tpu.dot_dimension_numbers<[1], [0], [0], [1], [0, 0, 1, 1], [], []>} : vector<1x32xf32>, vector<32x96xf32>, vector<1x96xf32> -> vector<1x96xf32>
    %176 = vector.extract_strided_slice %174 {offsets = [0, 0], sizes = [1, 32], strides = [1, 1]} : vector<1x96xf32> to vector<1x32xf32>
    %177 = vector.extract_strided_slice %175 {offsets = [0, 0], sizes = [1, 32], strides = [1, 1]} : vector<1x96xf32> to vector<1x32xf32>
    %178 = arith.addf %176, %177 : vector<1x32xf32>
    %cst_52 = arith.constant 5.000000e-01 : f32
    %179 = vector.broadcast %cst_52 : f32 to vector<1x32xf32>
    %180 = arith.mulf %179, %178 : vector<1x32xf32>
    %181 = math.tanh %180 : vector<1x32xf32>
    %cst_53 = arith.constant 1.000000e+00 : f32
    %182 = vector.broadcast %cst_53 : f32 to vector<1x32xf32>
    %183 = arith.addf %181, %182 : vector<1x32xf32>
    %cst_54 = arith.constant 5.000000e-01 : f32
    %184 = vector.broadcast %cst_54 : f32 to vector<1x32xf32>
    %185 = arith.mulf %184, %183 : vector<1x32xf32>
    %186 = vector.extract_strided_slice %174 {offsets = [0, 32], sizes = [1, 32], strides = [1, 1]} : vector<1x96xf32> to vector<1x32xf32>
    %187 = vector.extract_strided_slice %175 {offsets = [0, 32], sizes = [1, 32], strides = [1, 1]} : vector<1x96xf32> to vector<1x32xf32>
    %188 = arith.addf %186, %187 : vector<1x32xf32>
    %cst_55 = arith.constant 5.000000e-01 : f32
    %189 = vector.broadcast %cst_55 : f32 to vector<1x32xf32>
    %190 = arith.mulf %189, %188 : vector<1x32xf32>
    %191 = math.tanh %190 : vector<1x32xf32>
    %cst_56 = arith.constant 1.000000e+00 : f32
    %192 = vector.broadcast %cst_56 : f32 to vector<1x32xf32>
    %193 = arith.addf %191, %192 : vector<1x32xf32>
    %cst_57 = arith.constant 5.000000e-01 : f32
    %194 = vector.broadcast %cst_57 : f32 to vector<1x32xf32>
    %195 = arith.mulf %194, %193 : vector<1x32xf32>
    %196 = vector.extract_strided_slice %174 {offsets = [0, 64], sizes = [1, 32], strides = [1, 1]} : vector<1x96xf32> to vector<1x32xf32>
    %197 = vector.extract_strided_slice %175 {offsets = [0, 64], sizes = [1, 32], strides = [1, 1]} : vector<1x96xf32> to vector<1x32xf32>
    %198 = arith.addf %197, %7 : vector<1x32xf32>
    %199 = arith.mulf %185, %198 : vector<1x32xf32>
    %200 = arith.addf %196, %199 : vector<1x32xf32>
    %201 = math.tanh %200 : vector<1x32xf32>
    %cst_58 = arith.constant 1.000000e+00 : f32
    %202 = vector.broadcast %cst_58 : f32 to vector<1x32xf32>
    %203 = arith.subf %202, %195 : vector<1x32xf32>
    %204 = arith.mulf %203, %201 : vector<1x32xf32>
    %205 = arith.mulf %195, %173 : vector<1x32xf32>
    %206 = arith.addf %204, %205 : vector<1x32xf32>
    %207 = vector.extract_strided_slice %5 {offsets = [6, 0], sizes = [1, 96], strides = [1, 1]} : vector<8x96xf32> to vector<1x96xf32>
    %cst_59 = arith.constant dense<0.000000e+00> : vector<1x96xf32>
    %208 = tpu.matmul %206, %6, %cst_59 {dimension_numbers = #tpu.dot_dimension_numbers<[1], [0], [0], [1], [0, 0, 1, 1], [], []>} : vector<1x32xf32>, vector<32x96xf32>, vector<1x96xf32> -> vector<1x96xf32>
    %209 = vector.extract_strided_slice %207 {offsets = [0, 0], sizes = [1, 32], strides = [1, 1]} : vector<1x96xf32> to vector<1x32xf32>
    %210 = vector.extract_strided_slice %208 {offsets = [0, 0], sizes = [1, 32], strides = [1, 1]} : vector<1x96xf32> to vector<1x32xf32>
    %211 = arith.addf %209, %210 : vector<1x32xf32>
    %cst_60 = arith.constant 5.000000e-01 : f32
    %212 = vector.broadcast %cst_60 : f32 to vector<1x32xf32>
    %213 = arith.mulf %212, %211 : vector<1x32xf32>
    %214 = math.tanh %213 : vector<1x32xf32>
    %cst_61 = arith.constant 1.000000e+00 : f32
    %215 = vector.broadcast %cst_61 : f32 to vector<1x32xf32>
    %216 = arith.addf %214, %215 : vector<1x32xf32>
    %cst_62 = arith.constant 5.000000e-01 : f32
    %217 = vector.broadcast %cst_62 : f32 to vector<1x32xf32>
    %218 = arith.mulf %217, %216 : vector<1x32xf32>
    %219 = vector.extract_strided_slice %207 {offsets = [0, 32], sizes = [1, 32], strides = [1, 1]} : vector<1x96xf32> to vector<1x32xf32>
    %220 = vector.extract_strided_slice %208 {offsets = [0, 32], sizes = [1, 32], strides = [1, 1]} : vector<1x96xf32> to vector<1x32xf32>
    %221 = arith.addf %219, %220 : vector<1x32xf32>
    %cst_63 = arith.constant 5.000000e-01 : f32
    %222 = vector.broadcast %cst_63 : f32 to vector<1x32xf32>
    %223 = arith.mulf %222, %221 : vector<1x32xf32>
    %224 = math.tanh %223 : vector<1x32xf32>
    %cst_64 = arith.constant 1.000000e+00 : f32
    %225 = vector.broadcast %cst_64 : f32 to vector<1x32xf32>
    %226 = arith.addf %224, %225 : vector<1x32xf32>
    %cst_65 = arith.constant 5.000000e-01 : f32
    %227 = vector.broadcast %cst_65 : f32 to vector<1x32xf32>
    %228 = arith.mulf %227, %226 : vector<1x32xf32>
    %229 = vector.extract_strided_slice %207 {offsets = [0, 64], sizes = [1, 32], strides = [1, 1]} : vector<1x96xf32> to vector<1x32xf32>
    %230 = vector.extract_strided_slice %208 {offsets = [0, 64], sizes = [1, 32], strides = [1, 1]} : vector<1x96xf32> to vector<1x32xf32>
    %231 = arith.addf %230, %7 : vector<1x32xf32>
    %232 = arith.mulf %218, %231 : vector<1x32xf32>
    %233 = arith.addf %229, %232 : vector<1x32xf32>
    %234 = math.tanh %233 : vector<1x32xf32>
    %cst_66 = arith.constant 1.000000e+00 : f32
    %235 = vector.broadcast %cst_66 : f32 to vector<1x32xf32>
    %236 = arith.subf %235, %228 : vector<1x32xf32>
    %237 = arith.mulf %236, %234 : vector<1x32xf32>
    %238 = arith.mulf %228, %206 : vector<1x32xf32>
    %239 = arith.addf %237, %238 : vector<1x32xf32>
    %240 = vector.extract_strided_slice %5 {offsets = [7, 0], sizes = [1, 96], strides = [1, 1]} : vector<8x96xf32> to vector<1x96xf32>
    %cst_67 = arith.constant dense<0.000000e+00> : vector<1x96xf32>
    %241 = tpu.matmul %239, %6, %cst_67 {dimension_numbers = #tpu.dot_dimension_numbers<[1], [0], [0], [1], [0, 0, 1, 1], [], []>} : vector<1x32xf32>, vector<32x96xf32>, vector<1x96xf32> -> vector<1x96xf32>
    %242 = vector.extract_strided_slice %240 {offsets = [0, 0], sizes = [1, 32], strides = [1, 1]} : vector<1x96xf32> to vector<1x32xf32>
    %243 = vector.extract_strided_slice %241 {offsets = [0, 0], sizes = [1, 32], strides = [1, 1]} : vector<1x96xf32> to vector<1x32xf32>
    %244 = arith.addf %242, %243 : vector<1x32xf32>
    %cst_68 = arith.constant 5.000000e-01 : f32
    %245 = vector.broadcast %cst_68 : f32 to vector<1x32xf32>
    %246 = arith.mulf %245, %244 : vector<1x32xf32>
    %247 = math.tanh %246 : vector<1x32xf32>
    %cst_69 = arith.constant 1.000000e+00 : f32
    %248 = vector.broadcast %cst_69 : f32 to vector<1x32xf32>
    %249 = arith.addf %247, %248 : vector<1x32xf32>
    %cst_70 = arith.constant 5.000000e-01 : f32
    %250 = vector.broadcast %cst_70 : f32 to vector<1x32xf32>
    %251 = arith.mulf %250, %249 : vector<1x32xf32>
    %252 = vector.extract_strided_slice %240 {offsets = [0, 32], sizes = [1, 32], strides = [1, 1]} : vector<1x96xf32> to vector<1x32xf32>
    %253 = vector.extract_strided_slice %241 {offsets = [0, 32], sizes = [1, 32], strides = [1, 1]} : vector<1x96xf32> to vector<1x32xf32>
    %254 = arith.addf %252, %253 : vector<1x32xf32>
    %cst_71 = arith.constant 5.000000e-01 : f32
    %255 = vector.broadcast %cst_71 : f32 to vector<1x32xf32>
    %256 = arith.mulf %255, %254 : vector<1x32xf32>
    %257 = math.tanh %256 : vector<1x32xf32>
    %cst_72 = arith.constant 1.000000e+00 : f32
    %258 = vector.broadcast %cst_72 : f32 to vector<1x32xf32>
    %259 = arith.addf %257, %258 : vector<1x32xf32>
    %cst_73 = arith.constant 5.000000e-01 : f32
    %260 = vector.broadcast %cst_73 : f32 to vector<1x32xf32>
    %261 = arith.mulf %260, %259 : vector<1x32xf32>
    %262 = vector.extract_strided_slice %240 {offsets = [0, 64], sizes = [1, 32], strides = [1, 1]} : vector<1x96xf32> to vector<1x32xf32>
    %263 = vector.extract_strided_slice %241 {offsets = [0, 64], sizes = [1, 32], strides = [1, 1]} : vector<1x96xf32> to vector<1x32xf32>
    %264 = arith.addf %263, %7 : vector<1x32xf32>
    %265 = arith.mulf %251, %264 : vector<1x32xf32>
    %266 = arith.addf %262, %265 : vector<1x32xf32>
    %267 = math.tanh %266 : vector<1x32xf32>
    %cst_74 = arith.constant 1.000000e+00 : f32
    %268 = vector.broadcast %cst_74 : f32 to vector<1x32xf32>
    %269 = arith.subf %268, %261 : vector<1x32xf32>
    %270 = arith.mulf %269, %267 : vector<1x32xf32>
    %271 = arith.mulf %261, %239 : vector<1x32xf32>
    %272 = arith.addf %270, %271 : vector<1x32xf32>
    %c0_75 = arith.constant 0 : index
    %c0_76 = arith.constant 0 : index
    %273 = vector.load %arg13[%c0_75, %c0_76] : memref<1x32xf32, #tpu.memory_space<vmem>>, vector<1x32xf32>
    tpu.vector_store %arg13[%c0_75, %c0_76], %272 {strides = array<i32>} : memref<1x32xf32, #tpu.memory_space<vmem>>, vector<1x32xf32>,
    %c0_77 = arith.constant 0 : index
    %c0_78 = arith.constant 0 : index
    %274 = vector.load %arg6[%c0_77, %c0_78] : memref<32x64xf32, #tpu.memory_space<vmem>>, vector<32x64xf32>
    %cst_79 = arith.constant dense<0.000000e+00> : vector<1x64xf32>
    %275 = tpu.matmul %272, %274, %cst_79 {dimension_numbers = #tpu.dot_dimension_numbers<[1], [0], [0], [1], [0, 0, 1, 1], [], []>} : vector<1x32xf32>, vector<32x64xf32>, vector<1x64xf32> -> vector<1x64xf32>
    %c0_80 = arith.constant 0 : index
    %c0_81 = arith.constant 0 : index
    %276 = vector.load %arg7[%c0_80, %c0_81] : memref<1x64xf32, #tpu.memory_space<vmem>>, vector<1x64xf32>
    %277 = arith.addf %275, %276 : vector<1x64xf32>
    %cst_82 = arith.constant 0.000000e+00 : f32
    %278 = vector.broadcast %cst_82 : f32 to vector<1x64xf32>
    %279 = arith.maximumf %277, %278 : vector<1x64xf32>
    %c0_83 = arith.constant 0 : index
    %c0_84 = arith.constant 0 : index
    %280 = vector.load %arg8[%c0_83, %c0_84] : memref<64x4xf32, #tpu.memory_space<vmem>>, vector<64x4xf32>
    %cst_85 = arith.constant dense<0.000000e+00> : vector<1x4xf32>
    %281 = tpu.matmul %279, %280, %cst_85 {dimension_numbers = #tpu.dot_dimension_numbers<[1], [0], [0], [1], [0, 0, 1, 1], [], []>} : vector<1x64xf32>, vector<64x4xf32>, vector<1x4xf32> -> vector<1x4xf32>
    %c0_86 = arith.constant 0 : index
    %c0_87 = arith.constant 0 : index
    %282 = vector.load %arg9[%c0_86, %c0_87] : memref<1x4xf32, #tpu.memory_space<vmem>>, vector<1x4xf32>
    %283 = arith.addf %281, %282 : vector<1x4xf32>
    %cst_88 = arith.constant 5.000000e-01 : f32
    %284 = vector.broadcast %cst_88 : f32 to vector<1x4xf32>
    %285 = arith.mulf %284, %283 : vector<1x4xf32>
    %286 = math.tanh %285 : vector<1x4xf32>
    %cst_89 = arith.constant 1.000000e+00 : f32
    %287 = vector.broadcast %cst_89 : f32 to vector<1x4xf32>
    %288 = arith.addf %286, %287 : vector<1x4xf32>
    %cst_90 = arith.constant 5.000000e-01 : f32
    %289 = vector.broadcast %cst_90 : f32 to vector<1x4xf32>
    %290 = arith.mulf %289, %288 : vector<1x4xf32>
    %c0_91 = arith.constant 0 : index
    %c0_92 = arith.constant 0 : index
    %291 = vector.load %arg12[%c0_91, %c0_92] : memref<1x4xf32, #tpu.memory_space<vmem>>, vector<1x4xf32>
    tpu.vector_store %arg12[%c0_91, %c0_92], %290 {strides = array<i32>} : memref<1x4xf32, #tpu.memory_space<vmem>>, vector<1x4xf32>,
    %c0_93 = arith.constant 0 : index
    %c0_94 = arith.constant 0 : index
    %292 = vector.load %arg10[%c0_93, %c0_94] : memref<1x4xf32, #tpu.memory_space<vmem>>, vector<1x4xf32>
    %293 = arith.subf %290, %292 : vector<1x4xf32>
    %cst_95 = arith.constant 0.000000e+00 : f32
    %294 = vector.broadcast %cst_95 : f32 to vector<1x4xf32>
    %295 = arith.cmpf ogt, %293, %294 : vector<1x4xf32>
    %296 = arith.extui %295 : vector<1x4xi1> to vector<1x4xi32>
    %297 = arith.sitofp %296 : vector<1x4xi32> to vector<1x4xf32>
    %c0_96 = arith.constant 0 : index
    %c0_97 = arith.constant 0 : index
    %298 = vector.load %arg11[%c0_96, %c0_97] : memref<1x4xf32, #tpu.memory_space<vmem>>, vector<1x4xf32>
    tpu.vector_store %arg11[%c0_96, %c0_97], %297 {strides = array<i32>} : memref<1x4xf32, #tpu.memory_space<vmem>>, vector<1x4xf32>,
    return
  }
}

</mosaic_0001>

<bundles_post_ra>
// kernel: tpu_custom_call.1
= control target key start
LH: loop header
LB: loop body
LE: loop exit
PB: predicated region body
PF: predicated region fallthrough
CT: control target
= control target key end

     0   :  { %19 = vsyncpa [#allocation3], 0  ;;  %s1163_s0 = inlined_call_operand.hbm [shape: f32[8,16], index: 0, kind: input, shape index: {}]   ;;  %s1164_s1 = inlined_call_operand.hbm [shape: f32[16,96], index: 1, kind: input, shape index: {}]   ;;  %s1165_s2 = inlined_call_operand.vmem [shape: f32[32,96], index: 2, kind: input, shape index: {}]   ;;  %s1166_s3 = inlined_call_operand.vmem [shape: f32[1,96], index: 3, kind: input, shape index: {}]   ;;  %s1167_s4 = inlined_call_operand.vmem [shape: f32[1,32], index: 4, kind: input, shape index: {}]   ;;  %s1168_s5 = inlined_call_operand.vmem [shape: f32[1,32], index: 5, kind: input, shape index: {}]   ;;  %s1169_s6 = inlined_call_operand.vmem [shape: f32[32,64], index: 6, kind: input, shape index: {}]   ;;  %s1170_s7 = inlined_call_operand.vmem [shape: f32[1,64], index: 7, kind: input, shape index: {}]   ;;  %s1171_s8 = inlined_call_operand.vmem [shape: f32[64,4], index: 8, kind: input, shape index: {}]   ;;  %s1172_s9 = inlined_call_operand.vmem [shape: f32[1,4], index: 9, kind: input, shape index: {}]   ;;  %s1173_s10 = inlined_call_operand.vmem [shape: f32[1,4], index: 10, kind: input, shape index: {}]   ;;  %s1174_s11 = inlined_call_operand.hbm [shape: f32[1,4], index: 11, kind: output, shape index: {0}]   ;;  %s1175_s12 = inlined_call_operand.hbm [shape: f32[1,4], index: 12, kind: output, shape index: {1}]   ;;  %s1176_s13 = inlined_call_operand.hbm [shape: f32[1,32], index: 13, kind: output, shape index: {2}]  }
   0x1   :  { %20 = vsyncpa [#allocation6], 0 }
   0x2   :  { %21 = vsyncpa [#allocation4], 0 }
   0x3   :  { %22 = vsyncpa [#allocation9], 0  ;;  %s28_s27 = sshll.u32 %s1163_s0, 4  ;;  %s885_s28 = smov [#allocation2]   ;;  %s29_s27 = int_to_ptr.hbm [resolvable:$true] %s28_s27 }
   0x4   :  { %s30_s29 = sshll.u32 %s885_s28, 4  ;;  %s38_s15 = sshll.u32 %s1164_s1, 4  ;;  %s31_s29 = int_to_ptr.vmem [resolvable:$true] %s30_s29  ;;  %s39_s15 = int_to_ptr.hbm [resolvable:$true] %s38_s15 }
   0x5   :  { %33 = dma.hbm_to_vmem [thread:$0]  %s29_s27, 128, %s31_s29, [#allocation3]  }
   0x6   :  { %s886_s16 = smov [#allocation5]   ;;  %s887_s18 = smov 128  }
   0x7   :  { %s40_s17 = sshll.u32 %s886_s16, 4  ;;  %s888_s19 = smov 8   ;;  %s41_s17 = int_to_ptr.vmem [resolvable:$true] %s40_s17 }
   0x8   :  { %46 = dma.hbm_to_vmem [thread:$0]  %s39_s15, 256, %s41_s17, [#allocation6], %s887_s18, %s887_s18, %s888_s19  }
   0x9   :  { %877 = dma.done.wait [#allocation3], 128  }
   0xa   :  { %878 = vsyncadd [#allocation3], 4294967168 }
   0xb   :  { %879 = dma.done.wait [#allocation6], 256  }
   0xc   :  { %880 = vsyncadd [#allocation6], 4294967040  ;;  %v975_v0 = vld [vmem:[%s1165_s2 + $0x18] sm:$0xff]  ;;  %v75_v1 = vld [vmem:[#allocation5 + $0x8] sm:$0xff]  ;;  %vm80_vm0 = vcmask 130048   ;;  %vm110_vm1 = vcmask 261120  }
   0xd   :  { %v980_v2 = vld [vmem:[%s1165_s2 + $0x10] sm:$0xff]  ;;  %126 = vmatpush.msra.mxu1 %v975_v0  ;;  %98 = vmatpush.msra.mxu0 %v75_v1  ;;  %v74_v3 = vld [vmem:[#allocation5] sm:$0xff]  ;;  %v73_v4 = vld [vmem:[#allocation2] sm:$0xff]  ;;  %s890_s15 = smov 32   ;;  %vm570_vm2 = vcmask 261127   ;;  %vm612_vm3 = vcmask 523264  }
   0xe   :  { %v986_v5 = vld [vmem:[%s1165_s2 + $0x8] sm:$0xff]  ;;  %185 = vmatpush.msra.mxu3 %v975_v0  ;;  %413 = vmatpush.msra.mxu2 %v975_v0  ;;  %v720_v6 = vld [vmem:[%s1167_s4] ss:$0 sm:$0xff]  ;;  %s889_s4 = smov 64   ;;  %s893_s1 = smov [#allocation10]   ;;  %vm640_vm4 = vcmask 24576  }
   0xf   :  { %127 = vmatpush.msra.mxu1 %v980_v2  ;;  %99 = vmatpush.msra.mxu0 %v74_v3  ;;  %v721_v7 = vld [vmem:[%s1168_s5] ss:$0 sm:$0xff]  ;;  %s675_s22 = sshll.u32 %s893_s1, 4  ;;  %s677_s25 = sshll.u32 %s1176_s13, 4  ;;  %s676_s22 = int_to_ptr.vmem [resolvable:$true] %s675_s22  ;;  %s678_s25 = int_to_ptr.hbm [resolvable:$true] %s677_s25 }
  0x10   :  { %697 = vmatmul.msk.f32.vlgmr.msra.gmra.mxu0 %vm80_vm0, %v73_v4  ;;  %v1000_v8 = vld [vmem:[%s1165_s2] sm:$0xff]  ;;  %186 = vmatpush.msra.mxu3 %v980_v2  ;;  %s894_s27 = smov [#allocation7]   ;;  %s655_s30 = sshll.u32 %s1174_s11, 4  ;;  %s656_s30 = int_to_ptr.hbm [resolvable:$true] %s655_s30 }
  0x11   :  { %128 = vmatpush.msra.mxu1 %v986_v5  ;;  %v109_v9 = vld [vmem:[%s1168_s5] sm:$0x1]  ;;  %141 = vrot.lane.b32.xlu0 %v720_v6, %s889_s4  ;;  %s653_s28 = sshll.u32 %s894_s27, 4  ;;  %s654_s28 = int_to_ptr.vmem [resolvable:$true] %s653_s28 }
  0x12   :  { %163 = vrot.lane.b32.xlu2 %v721_v7, %s890_s15  ;;  %187 = vmatpush.msra.mxu3 %v986_v5  ;;  %v722_v13 = vld [vmem:[%s1166_s3] ss:$0 sm:$0xff]  ;;  %s891_s3 = smov 96  }
  0x13   :  { %129 = vmatpush.msra.mxu1 %v1000_v8  ;;  %299 = vmatpush.msrb.mxu0 %v975_v0 }
  0x14   :  { %698 = vmatmul.msk.f32.vlgmr.msra.gmra.mxu1 %vm110_vm1, %v109_v9  ;;  %188 = vmatpush.msra.mxu3 %v1000_v8 }
  0x15   :  { %300 = vmatpush.msrb.mxu0 %v980_v2  ;;  %356 = vmatpush.msrb.mxu1 %v975_v0 }
  0x16   :  { %242 = vmatpush.msrb.mxu3 %v975_v0  ;;  %414 = vmatpush.msra.mxu2 %v980_v2 }
  0x17   :  { %301 = vmatpush.msrb.mxu0 %v986_v5  ;;  %357 = vmatpush.msrb.mxu1 %v980_v2 }
  0x18   :  { %243 = vmatpush.msrb.mxu3 %v980_v2  ;;  %415 = vmatpush.msra.mxu2 %v986_v5 }
  0x19   :  { %302 = vmatpush.msrb.mxu0 %v1000_v8  ;;  %358 = vmatpush.msrb.mxu1 %v986_v5 }
  0x1a   :  { %244 = vmatpush.msrb.mxu3 %v986_v5  ;;  %416 = vmatpush.msra.mxu2 %v1000_v8 }
  0x1b   :  { %527 = vmatpush.msra.mxu0 %v975_v0  ;;  %359 = vmatpush.msrb.mxu1 %v1000_v8 }
  0x1c   :  { %245 = vmatpush.msrb.mxu3 %v1000_v8 }
  0x1d   :  { %528 = vmatpush.msra.mxu0 %v980_v2 }
  0x1f   :  { %529 = vmatpush.msra.mxu0 %v986_v5 }
  0x21   :  { %530 = vmatpush.msra.mxu0 %v1000_v8 }
  0x6c   :  { %v164_v26 = vpop.permute.xlu2 %163 }
  0x83   :  { %v1031_v10 = vpop.permute.xlu0 %141 }
  0x8d   :  { %v101_v14 = vpop.f32.mrf.mxu0 }
  0x8e   :  { %v1038_v15 = vadd.f32 %v722_v13, %v101_v14 }
  0x91   :  { %v131_v11 = vpop.f32.mrf.mxu1 }
  0x92   :  { %v144_v12 = vadd.f32 %v1031_v10, %v131_v11  ;;  %v134_v16 = vadd.f32 %v131_v11, %v1038_v15 }
  0x94   :  { %146 = vrot.lane.b32.xlu0 %v144_v12, %s889_s4  ;;  %v135_v17 = vmul.f32 0.5, %v134_v16 }
  0x96   :  { %723 = vtanh.f32 %v135_v17 }
  0x9c   :  { %v724_v18 = vpop.eup %723 }
  0x9d   :  { %v137_v19 = vadd.f32 1.0, %v724_v18 }
  0x9f   :  { %v138_v20 = vmul.f32 0.5, %v137_v19 }
  0xa1   :  { %v156_v27 = vsub.f32 1.0, %v138_v20  ;;  %v166_v29 = vmul.f32 %v164_v26, %v138_v20 }
 0x106   :  { %v147_v21 = vpop.permute.xlu0 %146 }
 0x107   :  { %v149_v22 = vmul.f32 %v147_v21, %v138_v20 }
 0x109   :  { %151 = vrot.lane.b32.xlu1 %v149_v22, %s889_s4 }
 0x17b   :  { %v152_v23 = vpop.permute.xlu1 %151 }
 0x17c   :  { %v154_v24 = vadd.f32 %v152_v23, %v1038_v15 }
 0x17e   :  { %725 = vtanh.f32 %v154_v24 }
 0x184   :  { %v726_v25 = vpop.eup %725 }
 0x185   :  { %158 = vrot.lane.b32.xlu1 %v726_v25, %s891_s3 }
 0x1f7   :  { %v159_v28 = vpop.permute.xlu1 %158 }
 0x1f8   :  { %v161_v30 = vmul.f32 %v159_v28, %v156_v27 }
 0x1fa   :  { %v167_v31 = vadd.f32 %v166_v29, %v161_v30 }
 0x1fc   :  { %169 = vrot.lane.b32.xlu2 %v167_v31, %s891_s3  ;;  %v220_v47 = vrot.slane %v167_v31, 7 }
 0x256   :  { %v170_v32 = vpop.permute.xlu2 %169 }
 0x257   :  { %699 = vmatmul.msk.f32.vlgmr.msra.gmra.mxu3 %vm110_vm1, %v170_v32 }
 0x258   :  { %470 = vmatpush.msra.mxu3 %v975_v0 }
 0x25a   :  { %471 = vmatpush.msra.mxu3 %v980_v2 }
 0x25c   :  { %472 = vmatpush.msra.mxu3 %v986_v5 }
 0x25e   :  { %473 = vmatpush.msra.mxu3 %v1000_v8 }
 0x2da   :  { %v190_v33 = vpop.f32.mrf.mxu3 }
 0x2db   :  { %v201_v34 = vadd.f32 %v190_v33, %v1031_v10  ;;  %v194_v36 = vrot.slane %v190_v33, 7 }
 0x2dd   :  { %v203_v35 = vrot.slane %v201_v34, 7  ;;  %v196_v37 = vadd.f32 %v194_v36, %v1038_v15 }
 0x2df   :  { %204 = vrot.lane.b32.xlu0 %v203_v35, %s889_s4  ;;  %v197_v38 = vmul.f32 0.5, %v196_v37 }
 0x2e1   :  { %727 = vtanh.f32 %v197_v38 }
 0x2e7   :  { %v728_v39 = vpop.eup %727 }
 0x2e8   :  { %v199_v40 = vadd.f32 1.0, %v728_v39 }
 0x2ea   :  { %v200_v41 = vmul.f32 0.5, %v199_v40 }
 0x2ec   :  { %v214_v48 = vsub.f32 1.0, %v200_v41  ;;  %v222_v51 = vmul.f32 %v220_v47, %v200_v41 }
 0x351   :  { %v205_v42 = vpop.permute.xlu0 %204 }
 0x352   :  { %v207_v43 = vmul.f32 %v205_v42, %v200_v41 }
 0x354   :  { %209 = vrot.lane.b32.xlu1 %v207_v43, %s889_s4 }
 0x3c6   :  { %v210_v44 = vpop.permute.xlu1 %209 }
 0x3c7   :  { %v212_v45 = vadd.f32 %v210_v44, %v1038_v15 }
 0x3c9   :  { %729 = vtanh.f32 %v212_v45 }
 0x3cf   :  { %v730_v46 = vpop.eup %729 }
 0x3d0   :  { %216 = vrot.lane.b32.xlu2 %v730_v46, %s891_s3 }
 0x42a   :  { %v217_v49 = vpop.permute.xlu2 %216 }
 0x42b   :  { %v219_v50 = vmul.f32 %v217_v49, %v214_v48 }
 0x42d   :  { %v223_v52 = vadd.f32 %v222_v51, %v219_v50 }
 0x42f   :  { %v225_v53 = vrot.slane %v223_v52, 1  ;;  %v277_v5 = vrot.slane %v223_v52, 7 }
 0x431   :  { %226 = vrot.lane.b32.xlu0 %v225_v53, %s891_s3 }
 0x4a3   :  { %v227_v54 = vpop.permute.xlu0 %226 }
 0x4a4   :  { %700 = vmatmul.msk.f32.vlgmr.msrb.gmra.mxu3 %vm110_vm1, %v227_v54 }
 0x527   :  { %v247_v55 = vpop.f32.mrf.mxu3 }
 0x528   :  { %v258_v56 = vadd.f32 %v247_v55, %v1031_v10  ;;  %v251_v58 = vrot.slane %v247_v55, 6 }
 0x52a   :  { %v260_v57 = vrot.slane %v258_v56, 6  ;;  %v253_v59 = vadd.f32 %v251_v58, %v1038_v15 }
 0x52c   :  { %261 = vrot.lane.b32.xlu1 %v260_v57, %s889_s4  ;;  %v254_v60 = vmul.f32 0.5, %v253_v59 }
 0x52e   :  { %731 = vtanh.f32 %v254_v60 }
 0x534   :  { %v732_v61 = vpop.eup %731 }
 0x535   :  { %v256_v62 = vadd.f32 1.0, %v732_v61 }
 0x537   :  { %v257_v63 = vmul.f32 0.5, %v256_v62 }
 0x539   :  { %v271_v6 = vsub.f32 1.0, %v257_v63  ;;  %v279_v8 = vmul.f32 %v277_v5, %v257_v63 }
 0x59e   :  { %v262_v0 = vpop.permute.xlu1 %261 }
 0x59f   :  { %v264_v1 = vmul.f32 %v262_v0, %v257_v63 }
 0x5a1   :  { %266 = vrot.lane.b32.xlu2 %v264_v1, %s889_s4 }
 0x5fb   :  { %v267_v2 = vpop.permute.xlu2 %266 }
 0x5fc   :  { %v269_v3 = vadd.f32 %v267_v2, %v1038_v15 }
 0x5fe   :  { %733 = vtanh.f32 %v269_v3 }
 0x604   :  { %v734_v4 = vpop.eup %733 }
 0x605   :  { %273 = vrot.lane.b32.xlu0 %v734_v4, %s891_s3 }
 0x677   :  { %v274_v7 = vpop.permute.xlu0 %273 }
 0x678   :  { %v276_v9 = vmul.f32 %v274_v7, %v271_v6 }
 0x67a   :  { %v280_v11 = vadd.f32 %v279_v8, %v276_v9 }
 0x67c   :  { %v282_v12 = vrot.slane %v280_v11, 2  ;;  %v334_v29 = vrot.slane %v280_v11, 7 }
 0x67e   :  { %283 = vrot.lane.b32.xlu1 %v282_v12, %s891_s3 }
 0x6f0   :  { %v284_v13 = vpop.permute.xlu1 %283 }
 0x6f1   :  { %701 = vmatmul.msk.f32.vlgmr.msrb.gmra.mxu0 %vm110_vm1, %v284_v13 }
 0x76e   :  { %v304_v14 = vpop.f32.mrf.mxu0 }
 0x76f   :  { %v315_v16 = vadd.f32 %v304_v14, %v1031_v10  ;;  %v308_v18 = vrot.slane %v304_v14, 5 }
 0x771   :  { %v317_v17 = vrot.slane %v315_v16, 5  ;;  %v310_v19 = vadd.f32 %v308_v18, %v1038_v15 }
 0x773   :  { %318 = vrot.lane.b32.xlu2 %v317_v17, %s889_s4  ;;  %v311_v20 = vmul.f32 0.5, %v310_v19 }
 0x775   :  { %735 = vtanh.f32 %v311_v20 }
 0x77b   :  { %v736_v21 = vpop.eup %735 }
 0x77c   :  { %v313_v22 = vadd.f32 1.0, %v736_v21 }
 0x77e   :  { %v314_v23 = vmul.f32 0.5, %v313_v22 }
 0x780   :  { %v328_v30 = vsub.f32 1.0, %v314_v23  ;;  %v336_v32 = vmul.f32 %v334_v29, %v314_v23 }
 0x7cd   :  { %v319_v24 = vpop.permute.xlu2 %318 }
 0x7ce   :  { %v321_v25 = vmul.f32 %v319_v24, %v314_v23 }
 0x7d0   :  { %323 = vrot.lane.b32.xlu0 %v321_v25, %s889_s4 }
 0x842   :  { %v324_v26 = vpop.permute.xlu0 %323 }
 0x843   :  { %v326_v27 = vadd.f32 %v324_v26, %v1038_v15 }
 0x845   :  { %737 = vtanh.f32 %v326_v27 }
 0x84b   :  { %v738_v28 = vpop.eup %737 }
 0x84c   :  { %330 = vrot.lane.b32.xlu1 %v738_v28, %s891_s3 }
 0x8be   :  { %v331_v31 = vpop.permute.xlu1 %330 }
 0x8bf   :  { %v333_v33 = vmul.f32 %v331_v31, %v328_v30 }
 0x8c1   :  { %v337_v34 = vadd.f32 %v336_v32, %v333_v33 }
 0x8c3   :  { %v339_v35 = vrot.slane %v337_v34, 3  ;;  %v391_v51 = vrot.slane %v337_v34, 7 }
 0x8c5   :  { %340 = vrot.lane.b32.xlu2 %v339_v35, %s891_s3 }
 0x91f   :  { %v341_v36 = vpop.permute.xlu2 %340 }
 0x920   :  { %702 = vmatmul.msk.f32.vlgmr.msrb.gmra.mxu1 %vm110_vm1, %v341_v36 }
 0x99d   :  { %v361_v37 = vpop.f32.mrf.mxu1 }
 0x99e   :  { %v372_v38 = vadd.f32 %v361_v37, %v1031_v10  ;;  %v365_v40 = vrot.slane %v361_v37, 4 }
 0x9a0   :  { %v374_v39 = vrot.slane %v372_v38, 4  ;;  %v367_v41 = vadd.f32 %v365_v40, %v1038_v15 }
 0x9a2   :  { %375 = vrot.lane.b32.xlu0 %v374_v39, %s889_s4  ;;  %v368_v42 = vmul.f32 0.5, %v367_v41 }
 0x9a4   :  { %739 = vtanh.f32 %v368_v42 }
 0x9aa   :  { %v740_v43 = vpop.eup %739 }
 0x9ab   :  { %v370_v44 = vadd.f32 1.0, %v740_v43 }
 0x9ad   :  { %v371_v45 = vmul.f32 0.5, %v370_v44 }
 0x9af   :  { %v385_v52 = vsub.f32 1.0, %v371_v45  ;;  %v393_v54 = vmul.f32 %v391_v51, %v371_v45 }
 0xa14   :  { %v376_v46 = vpop.permute.xlu0 %375 }
 0xa15   :  { %v378_v47 = vmul.f32 %v376_v46, %v371_v45 }
 0xa17   :  { %380 = vrot.lane.b32.xlu1 %v378_v47, %s889_s4 }
 0xa89   :  { %v381_v48 = vpop.permute.xlu1 %380 }
 0xa8a   :  { %v383_v49 = vadd.f32 %v381_v48, %v1038_v15 }
 0xa8c   :  { %741 = vtanh.f32 %v383_v49 }
 0xa92   :  { %v742_v50 = vpop.eup %741 }
 0xa93   :  { %387 = vrot.lane.b32.xlu2 %v742_v50, %s891_s3 }
 0xaed   :  { %v388_v53 = vpop.permute.xlu2 %387 }
 0xaee   :  { %v390_v55 = vmul.f32 %v388_v53, %v385_v52 }
 0xaf0   :  { %v394_v56 = vadd.f32 %v393_v54, %v390_v55  ;;  %v575_v54 = vld [vmem:[%s1169_s6 + $0x18] sm:$0xff]  ;;  %v574_v55 = vld [vmem:[%s1169_s6 + $0x10] sm:$0xff] }
 0xaf1   :  { %594 = vmatpush.msra.mxu1 %v575_v54 }
 0xaf2   :  { %v396_v57 = vrot.slane %v394_v56, 4  ;;  %v448_v9 = vrot.slane %v394_v56, 7  ;;  %v573_v56 = vld [vmem:[%s1169_s6 + $0x8] sm:$0xff] }
 0xaf3   :  { %595 = vmatpush.msra.mxu1 %v574_v55 }
 0xaf4   :  { %397 = vrot.lane.b32.xlu0 %v396_v57, %s891_s3 }
 0xaf5   :  { %596 = vmatpush.msra.mxu1 %v573_v56 }
 0xb66   :  { %v398_v58 = vpop.permute.xlu0 %397 }
 0xb67   :  { %703 = vmatmul.msk.f32.vlgmr.msra.gmra.mxu2 %vm110_vm1, %v398_v58 }
 0xbea   :  { %v418_v59 = vpop.f32.mrf.mxu2 }
 0xbeb   :  { %v429_v60 = vadd.f32 %v418_v59, %v1031_v10  ;;  %v422_v62 = vrot.slane %v418_v59, 3 }
 0xbed   :  { %v431_v61 = vrot.slane %v429_v60, 3  ;;  %v424_v63 = vadd.f32 %v422_v62, %v1038_v15 }
 0xbef   :  { %432 = vrot.lane.b32.xlu1 %v431_v61, %s889_s4  ;;  %v425_v0 = vmul.f32 0.5, %v424_v63  ;;  %v572_v63 = vld [vmem:[%s1169_s6] sm:$0xff] }
 0xbf0   :  { %597 = vmatpush.msra.mxu1 %v572_v63 }
 0xbf1   :  { %743 = vtanh.f32 %v425_v0  ;;  %v610_v0 = vld [vmem:[%s1171_s8 + $0x38] sm:$0xff] }
 0xbf2   :  { %624 = vmatpush.msrb.mxu2 %v610_v0 }
 0xbf7   :  { %v744_v1 = vpop.eup %743 }
 0xbf8   :  { %v427_v2 = vadd.f32 1.0, %v744_v1  ;;  %v609_v1 = vld [vmem:[%s1171_s8 + $0x30] sm:$0xff] }
 0xbf9   :  { %625 = vmatpush.msrb.mxu2 %v609_v1 }
 0xbfa   :  { %v428_v3 = vmul.f32 0.5, %v427_v2  ;;  %v608_v2 = vld [vmem:[%s1171_s8 + $0x28] sm:$0xff] }
 0xbfb   :  { %626 = vmatpush.msrb.mxu2 %v608_v2 }
 0xbfc   :  { %v442_v11 = vsub.f32 1.0, %v428_v3  ;;  %v450_v13 = vmul.f32 %v448_v9, %v428_v3  ;;  %v603_v9 = vld [vmem:[%s1171_s8] sm:$0xff] }
 0xc61   :  { %v433_v4 = vpop.permute.xlu1 %432 }
 0xc62   :  { %v435_v5 = vmul.f32 %v433_v4, %v428_v3  ;;  %v607_v3 = vld [vmem:[%s1171_s8 + $0x20] sm:$0xff]  ;;  %v606_v4 = vld [vmem:[%s1171_s8 + $0x18] sm:$0xff] }
 0xc63   :  { %627 = vmatpush.msrb.mxu2 %v607_v3 }
 0xc64   :  { %437 = vrot.lane.b32.xlu2 %v435_v5, %s889_s4 }
 0xc65   :  { %628 = vmatpush.msrb.mxu2 %v606_v4 }
 0xcbe   :  { %v438_v6 = vpop.permute.xlu2 %437 }
 0xcbf   :  { %v440_v7 = vadd.f32 %v438_v6, %v1038_v15 }
 0xcc1   :  { %745 = vtanh.f32 %v440_v7  ;;  %v605_v7 = vld [vmem:[%s1171_s8 + $0x10] sm:$0xff] }
 0xcc2   :  { %629 = vmatpush.msrb.mxu2 %v605_v7 }
 0xcc7   :  { %v746_v8 = vpop.eup %745 }
 0xcc8   :  { %444 = vrot.lane.b32.xlu0 %v746_v8, %s891_s3  ;;  %v604_v8 = vld [vmem:[%s1171_s8 + $0x8] sm:$0xff]  ;;  %s892_s8 = smov [#allocation8]  }
 0xcc9   :  { %630 = vmatpush.msrb.mxu2 %v604_v8  ;;  %s664_s0 = sshll.u32 %s892_s8, 4  ;;  %s665_s0 = int_to_ptr.vmem [resolvable:$true] %s664_s0 }
 0xccb   :  { %631 = vmatpush.msrb.mxu2 %v603_v9 }
 0xd3a   :  { %v445_v12 = vpop.permute.xlu0 %444 }
 0xd3b   :  { %v447_v14 = vmul.f32 %v445_v12, %v442_v11  ;;  %v576_v11 = vld [vmem:[%s1170_s7] sm:$0x1]  ;;  %s666_s7 = sshll.u32 %s1175_s12, 4  ;;  %s667_s7 = int_to_ptr.hbm [resolvable:$true] %s666_s7 }
 0xd3d   :  { %v451_v16 = vadd.f32 %v450_v13, %v447_v14 }
 0xd3f   :  { %v453_v17 = vrot.slane %v451_v16, 5  ;;  %v505_v33 = vrot.slane %v451_v16, 7  ;;  %v611_v16 = vld [vmem:[%s1172_s9] sm:$0x1] }
 0xd41   :  { %454 = vrot.lane.b32.xlu1 %v453_v17, %s891_s3 }
 0xdb3   :  { %v455_v18 = vpop.permute.xlu1 %454 }
 0xdb4   :  { %704 = vmatmul.msk.f32.vlgmr.msra.gmra.mxu3 %vm110_vm1, %v455_v18 }
 0xe37   :  { %v475_v19 = vpop.f32.mrf.mxu3 }
 0xe38   :  { %v486_v20 = vadd.f32 %v475_v19, %v1031_v10  ;;  %v479_v22 = vrot.slane %v475_v19, 2 }
 0xe3a   :  { %v488_v21 = vrot.slane %v486_v20, 2  ;;  %v481_v23 = vadd.f32 %v479_v22, %v1038_v15  ;;  %v642_v22 = vld [vmem:[%s1173_s10] sm:$0x1] }
 0xe3c   :  { %489 = vrot.lane.b32.xlu2 %v488_v21, %s889_s4  ;;  %v482_v24 = vmul.f32 0.5, %v481_v23 }
 0xe3e   :  { %747 = vtanh.f32 %v482_v24 }
 0xe44   :  { %v748_v25 = vpop.eup %747 }
 0xe45   :  { %v484_v26 = vadd.f32 1.0, %v748_v25  ;;  %v895_v25 = vmov 0.0  }
 0xe47   :  { %v485_v27 = vmul.f32 0.5, %v484_v26 }
 0xe49   :  { %v499_v34 = vsub.f32 1.0, %v485_v27  ;;  %v507_v36 = vmul.f32 %v505_v33, %v485_v27 }
 0xe96   :  { %v490_v28 = vpop.permute.xlu2 %489 }
 0xe97   :  { %v492_v29 = vmul.f32 %v490_v28, %v485_v27 }
 0xe99   :  { %494 = vrot.lane.b32.xlu0 %v492_v29, %s889_s4 }
 0xf0b   :  { %v495_v30 = vpop.permute.xlu0 %494 }
 0xf0c   :  { %v497_v31 = vadd.f32 %v495_v30, %v1038_v15 }
 0xf0e   :  { %749 = vtanh.f32 %v497_v31 }
 0xf14   :  { %v750_v32 = vpop.eup %749 }
 0xf15   :  { %501 = vrot.lane.b32.xlu1 %v750_v32, %s891_s3 }
 0xf87   :  { %v502_v35 = vpop.permute.xlu1 %501 }
 0xf88   :  { %v504_v37 = vmul.f32 %v502_v35, %v499_v34 }
 0xf8a   :  { %v508_v38 = vadd.f32 %v507_v36, %v504_v37 }
 0xf8c   :  { %v510_v39 = vrot.slane %v508_v38, 6 }
 0xf8e   :  { %511 = vrot.lane.b32.xlu2 %v510_v39, %s891_s3 }
 0xfe8   :  { %v512_v40 = vpop.permute.xlu2 %511 }
 0xfe9   :  { %705 = vmatmul.msk.f32.vlgmr.msra.gmra.mxu0 %vm110_vm1, %v512_v40 }
0x1066   :  { %v532_v41 = vpop.f32.mrf.mxu0 }
0x1067   :  { %v543_v42 = vadd.f32 %v532_v41, %v1031_v10  ;;  %v536_v44 = vrot.slane %v532_v41, 1 }
0x1069   :  { %v545_v43 = vrot.slane %v543_v42, 1  ;;  %v538_v45 = vadd.f32 %v536_v44, %v1038_v15 }
0x106b   :  { %546 = vrot.lane.b32.xlu0 %v545_v43, %s889_s4  ;;  %v539_v46 = vmul.f32 0.5, %v538_v45 }
0x106d   :  { %751 = vtanh.f32 %v539_v46 }
0x1073   :  { %v752_v47 = vpop.eup %751 }
0x1074   :  { %v541_v48 = vadd.f32 1.0, %v752_v47 }
0x1076   :  { %v542_v49 = vmul.f32 0.5, %v541_v48 }
0x1078   :  { %v556_v57 = vsub.f32 1.0, %v542_v49 }
0x10dd   :  { %v547_v50 = vpop.permute.xlu0 %546 }
0x10de   :  { %v549_v51 = vmul.f32 %v547_v50, %v542_v49 }
0x10e0   :  { %551 = vrot.lane.b32.xlu1 %v549_v51, %s889_s4 }
0x1152   :  { %v552_v52 = vpop.permute.xlu1 %551 }
0x1153   :  { %v554_v53 = vadd.f32 %v552_v52, %v1038_v15  ;;  %v562_v15 = vrot.slane %v508_v38, 7 }
0x1155   :  { %753 = vtanh.f32 %v554_v53  ;;  %v564_v59 = vmul.f32 %v562_v15, %v542_v49 }
0x115b   :  { %v754_v10 = vpop.eup %753 }
0x115c   :  { %558 = vrot.lane.b32.xlu2 %v754_v10, %s891_s3 }
0x11b6   :  { %v559_v58 = vpop.permute.xlu2 %558 }
0x11b7   :  { %v561_v60 = vmul.f32 %v559_v58, %v556_v57 }
0x11b9   :  { %v565_v61 = vadd.f32 %v564_v59, %v561_v60 }
0x11bb   :  { %567 = vrot.lane.b32.xlu1 %v565_v61, %s891_s3  ;;  %v577_v62 = vrot.slane %v565_v61, 7 }
0x11bd   :  { %578 = vrot.lane.b32.xlu0 %v577_v62, %s891_s3 }
0x122d   :  { %v568_v5 = vpop.permute.xlu1 %567 }
0x122e   :  { %571 = vst.msk [vmem:[#allocation10 - $0x7] sm:$0x80] %vm570_vm2, %v568_v5 }
0x122f   :  { %v579_v6 = vpop.permute.xlu0 %578 }
0x1230   :  { %706 = vmatmul.msk.f32.vlgmr.msra.gmra.mxu1 %vm110_vm1, %v579_v6 }
0x12ad   :  { %v599_v12 = vpop.f32.mrf.mxu1 }
0x12ae   :  { %v600_v13 = vadd.f32 %v599_v12, %v576_v11 }
0x12b0   :  { %v602_v14 = vmax.f32 %v600_v13, 0.0 }
0x12b2   :  { %707 = vmatmul.msk.f32.vlgmr.msrb.gmra.mxu2 %vm612_vm3, %v602_v14 }
0x1335   :  { %v633_v17 = vpop.f32.mrf.mxu2 }
0x1336   :  { %v634_v18 = vadd.f32 %v633_v17, %v611_v16 }
0x1338   :  { %v636_v19 = vmul.f32 0.5, %v634_v18 }
0x133a   :  { %755 = vtanh.f32 %v636_v19 }
0x1340   :  { %v756_v20 = vpop.eup %755 }
0x1341   :  { %v638_v21 = vadd.f32 1.0, %v756_v20 }
0x1343   :  { %v639_v23 = vmul.f32 0.5, %v638_v21 }
0x1345   :  { %v643_v24 = vsub.f32 %v639_v23, %v642_v22  ;;  %641 = vst.msk [vmem:[#allocation8] sm:$0x1] %vm640_vm4, %v639_v23 }
0x1346   :  { %669 = dma.vmem_to_hbm [thread:$0]  %s665_s0, 16, %s667_s7, [#allocation9]  }
0x1347   :  { %vm644_vm5 = vcmp.gt.f32.partialorder %v643_v24, 0.0  ;;  %680 = dma.vmem_to_hbm [thread:$0]  %s676_s22, 16, %s678_s25, [#allocation9]  }
0x1348   :  { %v708_v26 = vsel %vm644_vm5, 1.0, %v895_v25 }
0x1349   :  { %647 = vst.msk [vmem:[#allocation7] sm:$0x1] %vm640_vm4, %v708_v26 }
0x134a   :  { %658 = dma.vmem_to_hbm [thread:$0]  %s654_s28, 16, %s656_s30, [#allocation4]  }
0x134b   :  { %881 = dma.done.wait [#allocation4], 16  }
0x134c   :  { %882 = vsyncadd [#allocation4], 4294967280 }
0x134d   :  { %883 = dma.done.wait [#allocation9], 32  }
0x134e   :  { %884 = vsyncadd [#allocation9], 4294967264 }
0x134f   :  { %693 = vsyncpa [#allocation3], 1 }
0x1350   :  { %694 = vsyncpa [#allocation6], 1 }
0x1351   :  { %695 = vsyncpa [#allocation4], 1 }
0x1352   :  { %696 = vsyncpa [#allocation9], 1 }

</bundles_post_ra>
